<compile_context>
chip_gen: v7x
topology: tpu7x:2x2x1
jax: 0.10.0
libtpu: 0.0.40
codegen_flags: <defaults>
</compile_context>

<pallas_src>
import math
from functools import partial

import jax
import jax.numpy as jnp
from jax import lax
from jax.experimental import pallas as pl
from jax.experimental.pallas import tpu as pltpu


def _dpp_conv2d_kernel(xp_ref, agg_ref, out_ref, *,
                       K, C, TH, WO, stride, dilation, fuse_taps):
    t = pl.program_id(1)
    row0 = pl.multiple_of(t * (TH * stride), TH * stride)

    def patch(kh, kw):
        rs = row0 + kh * dilation
        cs = kw * dilation
        if stride == 1:
            p = xp_ref[0, pl.ds(rs, TH), pl.ds(cs, WO), :]        # (TH, WO, C)
        else:
            # TODO(synk): strided sublane slicing (stride>1) is not exercised by
            # __main__; verify lowering + numerics before relying on it.
            p = xp_ref[0, pl.ds(rs, TH, stride=stride),
                       pl.ds(cs, WO, stride=stride), :]
        # cast to bf16 *before* any relayout so the concat / matmul operand path
        # moves half the bytes.
        return p.astype(jnp.bfloat16).reshape(TH * WO, C)

    if fuse_taps:
        # Small C: build one (TN, K*K*C) im2col tile and do a single fused matmul
        # (per-tap contraction would underfill the MXU contraction depth).
        cols = jnp.concatenate(
            [patch(kh, kw) for kh in range(K) for kw in range(K)], axis=-1)
        out_ref[0] = jnp.dot(cols, agg_ref[0],
                             preferred_element_type=jnp.float32).astype(out_ref.dtype)
    else:
        # Large C: K*K accumulated matmuls, no (TN, KK*C) materialization and no
        # cross-lane concatenate (store/XLU slots stop being the binding unit).
        acc = None
        for kh in range(K):
            for kw in range(K):
                w_tap = agg_ref[0, pl.ds((kh * K + kw) * C, C), :]     # (C, O_pad)
                c = jnp.dot(patch(kh, kw), w_tap,
                            preferred_element_type=jnp.float32)
                acc = c if acc is None else acc + c
        out_ref[0] = acc.astype(out_ref.dtype)


def _pick_tile_rows(HO, WO, target_rows):
    """Pick TH so that TH*WO is a multiple of 8 (sublane-aligned output block)
    and TH*WO <= target_rows when possible.  The last spatial tile may be ragged
    (handled by padding HO up to a multiple of TH and stripping the surplus)."""
    g = 8 // math.gcd(8, WO)                  # TH granule giving (TH*WO) % 8 == 0
    th = (target_rows // (g * WO)) * g
    if th < g:
        th = g
    th = min(th, ((HO + g - 1) // g) * g)     # no point exceeding (rounded-up) HO
    return th


def dpp_conv2d(x, params, *, kernel_size, stride=1, padding=0, dilation=1,
               num_pattern=4, temperature=0.5, block_rows=1024):
    """Pallas forward of DPPConv2d. x: (B, C, H, W) float32 (NCHW), groups=1."""
    weight = params["weight"]          # (P, O, C, K, K)
    threshold = params["threshold"]    # (P, O)
    a1_w = params["attn_w1"]           # (hidden, C)    Conv2d(C, hidden, 1, bias=False)
    a2_w = params["attn_w2"]           # (P*O, hidden)  Conv2d(hidden, P*O, 1, bias=True)
    a2_b = params["attn_b2"]           # (P*O,)

    B, C, H, W = x.shape
    P, O, Cw, K, K2 = weight.shape
    assert Cw == C and K == kernel_size and K2 == K and P == num_pattern
    HO = (H + 2 * padding - dilation * (K - 1) - 1) // stride + 1
    WO = (W + 2 * padding - dilation * (K - 1) - 1) // stride + 1
    N = HO * WO
    KK = K * K
    hidden = a1_w.shape[0]
    hp = lax.Precision.HIGHEST

    # ---- GPM2d attention branch: tiny (reduces to (B,P,O) scalars) -> XLA ----
    pooled = jnp.mean(x, axis=(2, 3))                                        # (B, C)
    hid = jax.nn.relu(jnp.dot(pooled, a1_w.reshape(hidden, C).T, precision=hp))
    logits = (jnp.dot(hid, a2_w.reshape(P * O, hidden).T, precision=hp)
              + a2_b).reshape(B, P, O)
    attn = jax.nn.softmax(logits / temperature, axis=1)                      # (B, P, O)

    # ---- pattern mask: BinaryStep(sigmoid(mean(|w| - th, dims=(O,C))) - 0.5) ----
    diff = jnp.abs(weight) - threshold[:, :, None, None, None]               # (P,O,C,K,K)
    gate = jax.nn.sigmoid(jnp.mean(diff, axis=(1, 2))) - 0.5                 # (P, K, K)
    mask = (gate > 0.0).astype(x.dtype)                                      # BinaryStep fwd
    masked_w = weight * mask[:, None, None, :, :]                            # (P,O,C,K,K)
    # contraction ordering = (kh, kw, c) to match the in-kernel im2col tile.
    mw = jnp.transpose(masked_w, (0, 3, 4, 2, 1)).reshape(P, KK * C, O)      # (P, KK*C, O)

    # ---- per-image aggregated weight, hoisted out of the kernel --------------
    # Exact f32 aggregation; only the MXU operand is bf16.  Zero O-padding keeps
    # output stores lane-dense and the padded columns exactly 0.
    O_pad = ((O + 127) // 128) * 128
    agg = jnp.einsum('bpo,pko->bko', attn, mw, precision=hp)                 # (B, KK*C, O)
    agg = jnp.pad(agg, ((0, 0), (0, 0), (0, O_pad - O))).astype(jnp.bfloat16)

    # ---- spatial tiling (ragged last tile allowed) ----------------------------
    TH = _pick_tile_rows(HO, WO, block_rows)
    TN = TH * WO
    n_tiles = -(-HO // TH)                       # cdiv
    HO_pad = n_tiles * TH
    N_pad = HO_pad * WO

    # ---- padded NHWC image (layout plumbing only; no im2col in HBM) ----------
    xp = jnp.transpose(x, (0, 2, 3, 1))                                      # (B, H, W, C)
    Hp = H + 2 * padding
    Wp = W + 2 * padding
    Hp_need = (HO_pad - 1) * stride + (K - 1) * dilation + 1   # rows the last tile reads
    extra_h = max(0, Hp_need - Hp)
    xp = jnp.pad(xp, ((0, 0), (padding, padding + extra_h),
                      (padding, padding), (0, 0)))
    Hp_tot = Hp + extra_h

    fuse_taps = C < 128          # small C: single fused matmul; big C: per-tap accumulation

    # ---- VMEM budget (binding on v5e's 16 MiB default scoped limit) ----------
    img_b = Hp_tot * Wp * C * 4
    agg_b = KK * C * O_pad * 2
    out_b = TN * O_pad * 2
    tmp_b = (TN * KK * C * 2 if fuse_taps else TN * C * 2) + TN * O_pad * 4
    vmem_limit = int(min(48 << 20,
                         max(32 << 20, 2 * (img_b + agg_b + out_b) + 2 * tmp_b + (4 << 20))))

    kernel = partial(_dpp_conv2d_kernel, K=K, C=C, TH=TH, WO=WO,
                     stride=stride, dilation=dilation, fuse_taps=fuse_taps)

    out = pl.pallas_call(
        kernel,
        out_shape=jax.ShapeDtypeStruct((B, N_pad, O_pad), jnp.bfloat16),
        grid_spec=pltpu.PrefetchScalarGridSpec(
            num_scalar_prefetch=0,
            grid=(B, n_tiles),
            in_specs=[
                # Whole padded image resident per batch element (constant over t).
                # TODO(synk): for large feature maps on v7x (64 MiB VMEM) switch to
                # memory_space=pl.ANY + manual row-band double-buffered DMA.
                pl.BlockSpec((1, Hp_tot, Wp, C), lambda b, t: (b, 0, 0, 0)),
                # Per-image aggregated weight (bf16), constant over t.
                pl.BlockSpec((1, KK * C, O_pad), lambda b, t: (b, 0, 0)),
            ],
            out_specs=pl.BlockSpec((1, TN, O_pad), lambda b, t: (b, t, 0)),
        ),
        compiler_params=pltpu.CompilerParams(
            dimension_semantics=("parallel", "parallel"),
            vmem_limit_bytes=vmem_limit),
    )(xp, agg)

    out = out[:, :N, :O].astype(jnp.float32)               # strip O / ragged-row padding
    # (B, N, O) -> (B, O, HO, WO)  (back to NCHW)
    return jnp.transpose(out, (0, 2, 1)).reshape(B, O, HO, WO)


def dpp_conv2d_reference(x, params, *, kernel_size, stride=1, padding=0,
                         dilation=1, num_pattern=4, temperature=0.5):
    """Plain-JAX replica of the PyTorch forward, used only for verification."""
    weight = params["weight"]; threshold = params["threshold"]
    a1_w = params["attn_w1"]; a2_w = params["attn_w2"]; a2_b = params["attn_b2"]
    B, C, H, W = x.shape
    P, O, _, K, _ = weight.shape
    hp = lax.Precision.HIGHEST

    pooled = jnp.mean(x, axis=(2, 3))                                        # (B, C)
    hid = jax.nn.relu(jnp.dot(pooled, a1_w.T, precision=hp))                 # (B, hidden)
    psa = (jnp.dot(hid, a2_w.T, precision=hp) + a2_b).reshape(B, P, O)
    attn = jax.nn.softmax(psa / temperature, axis=1)                         # (B, P, O)

    diff = jnp.abs(weight) - threshold[:, :, None, None, None]
    mask = ((jax.nn.sigmoid(jnp.mean(diff, axis=(1, 2))) - 0.5) > 0.0).astype(x.dtype)
    agg = jnp.einsum('pockl,pkl,bpo->bockl', weight, mask, attn, precision=hp)

    def conv_one(xi, wi):
        return lax.conv_general_dilated(
            xi[None], wi, window_strides=(stride, stride),
            padding=[(padding, padding), (padding, padding)],
            rhs_dilation=(dilation, dilation),
            dimension_numbers=('NCHW', 'OIHW', 'NCHW'),
            precision=hp)[0]

    return jax.vmap(conv_one)(x, agg)


if __name__ == "__main__":
    # Small shapes consistent with the module (groups=1 path).
    B, C, O = 2, 4, 8
    H = W = 16
    K, P = 3, 4
    stride, padding, dilation = 1, 1, 1
    ratio, temperature = 0.25, 0.5
    hidden = int(C * ratio) + 1          # GPM2d: in_planes != 3 -> int(C*ratio)+1

    key = jax.random.PRNGKey(0)
    kx, kw, k1, k2 = jax.random.split(key, 4)
    fan_in = C * K * K
    bound = math.sqrt(6.0 / fan_in)      # kaiming_uniform-style bound, deterministic
    params = {
        "weight": jax.random.uniform(kw, (P, O, C, K, K), jnp.float32, -bound, bound),
        "threshold": jnp.zeros((P, O), jnp.float32),                         # filled with 0.0
        "attn_w1": jax.random.normal(k1, (hidden, C), jnp.float32) * math.sqrt(2.0 / C),
        "attn_w2": jax.random.normal(k2, (P * O, hidden), jnp.float32) * math.sqrt(2.0 / hidden),
        "attn_b2": jnp.zeros((P * O,), jnp.float32),                         # init constant 0
    }
    x = jax.random.normal(kx, (B, C, H, W), jnp.float32)

    # block_rows=96 -> TH=6 with HO=16: three spatial tiles per image, ragged last
    # tile -> exercises the cdiv grid, extra-row padding and surplus-row stripping.
    out = dpp_conv2d(x, params, kernel_size=K, stride=stride, padding=padding,
                     dilation=dilation, num_pattern=P, temperature=temperature,
                     block_rows=96)
    out = jax.block_until_ready(out)

    ref = dpp_conv2d_reference(x, params, kernel_size=K, stride=stride,
                               padding=padding, dilation=dilation,
                               num_pattern=P, temperature=temperature)
    ref = jax.block_until_ready(ref)

    assert out.shape == (B, O, H, W), out.shape
    err = float(jnp.max(jnp.abs(out - ref)))
    rel = err / (float(jnp.max(jnp.abs(ref))) + 1e-6)
    # Tolerance vs. the f32-HIGHEST reference: conv matmul runs with bf16 operands
    # (f32 accumulation) and the kernel emits bf16 before the wrapper casts back.
    assert err < 1e-1 or rel < 2e-2, f"max abs error {err} (rel {rel})"
    print("KERNEL_OK")
</pallas_src>

<mosaic_0001>
module attributes {stable_mosaic.version = 11 : i64} {
  func.func @_dpp_conv2d_kernel(%arg0: i32, %arg1: i32, %arg2: memref<1x20x18x4xf32, #tpu.memory_space<vmem>>, %arg3: memref<1x36x128xbf16, #tpu.memory_space<vmem>>, %arg4: memref<1x96x128xbf16, #tpu.memory_space<vmem>>) attributes {dimension_semantics = [#tpu.dimension_semantics<parallel>, #tpu.dimension_semantics<parallel>], iteration_bounds = array<i64: 2, 3>, scalar_prefetch = 0 : i64, scratch_operands = 0 : i64, tpu.core_type = #tpu.core_type<tc>, window_params = [{transform_indices = @transform_0, window_bounds = array<i64: 1, 20, 18, 4>}, {transform_indices = @transform_1, window_bounds = array<i64: 1, 36, 128>}, {transform_indices = @transform_2, window_bounds = array<i64: 1, 96, 128>}]} {
    %c6_i32 = arith.constant 6 : i32
    %0 = arith.muli %arg1, %c6_i32 : i32
    %1 = tpu.assume_multiple %0, 6 : i32
    %c0_i32 = arith.constant 0 : i32
    %2 = arith.addi %1, %c0_i32 : i32
    %c0 = arith.constant 0 : index
    %3 = arith.index_cast %2 : i32 to index
    %c0_0 = arith.constant 0 : index
    %c0_1 = arith.constant 0 : index
    %4 = vector.load %arg2[%c0, %3, %c0_0, %c0_1] : memref<1x20x18x4xf32, #tpu.memory_space<vmem>>, vector<1x6x16x4xf32>
    %5 = vector.shape_cast %4 : vector<1x6x16x4xf32> to vector<6x16x4xf32>
    %6 = arith.truncf %5 : vector<6x16x4xf32> to vector<6x16x4xbf16>
    %7 = vector.shape_cast %6 : vector<6x16x4xbf16> to vector<96x4xbf16>
    %c0_i32_2 = arith.constant 0 : i32
    %8 = arith.addi %1, %c0_i32_2 : i32
    %c0_3 = arith.constant 0 : index
    %9 = arith.index_cast %8 : i32 to index
    %c1 = arith.constant 1 : index
    %c0_4 = arith.constant 0 : index
    %10 = vector.load %arg2[%c0_3, %9, %c1, %c0_4] : memref<1x20x18x4xf32, #tpu.memory_space<vmem>>, vector<1x6x16x4xf32>
    %11 = vector.shape_cast %10 : vector<1x6x16x4xf32> to vector<6x16x4xf32>
    %12 = arith.truncf %11 : vector<6x16x4xf32> to vector<6x16x4xbf16>
    %13 = vector.shape_cast %12 : vector<6x16x4xbf16> to vector<96x4xbf16>
    %c0_i32_5 = arith.constant 0 : i32
    %14 = arith.addi %1, %c0_i32_5 : i32
    %c0_6 = arith.constant 0 : index
    %15 = arith.index_cast %14 : i32 to index
    %c2 = arith.constant 2 : index
    %c0_7 = arith.constant 0 : index
    %16 = vector.load %arg2[%c0_6, %15, %c2, %c0_7] : memref<1x20x18x4xf32, #tpu.memory_space<vmem>>, vector<1x6x16x4xf32>
    %17 = vector.shape_cast %16 : vector<1x6x16x4xf32> to vector<6x16x4xf32>
    %18 = arith.truncf %17 : vector<6x16x4xf32> to vector<6x16x4xbf16>
    %19 = vector.shape_cast %18 : vector<6x16x4xbf16> to vector<96x4xbf16>
    %c1_i32 = arith.constant 1 : i32
    %20 = arith.addi %1, %c1_i32 : i32
    %c0_8 = arith.constant 0 : index
    %21 = arith.index_cast %20 : i32 to index
    %c0_9 = arith.constant 0 : index
    %c0_10 = arith.constant 0 : index
    %22 = vector.load %arg2[%c0_8, %21, %c0_9, %c0_10] : memref<1x20x18x4xf32, #tpu.memory_space<vmem>>, vector<1x6x16x4xf32>
    %23 = vector.shape_cast %22 : vector<1x6x16x4xf32> to vector<6x16x4xf32>
    %24 = arith.truncf %23 : vector<6x16x4xf32> to vector<6x16x4xbf16>
    %25 = vector.shape_cast %24 : vector<6x16x4xbf16> to vector<96x4xbf16>
    %c1_i32_11 = arith.constant 1 : i32
    %26 = arith.addi %1, %c1_i32_11 : i32
    %c0_12 = arith.constant 0 : index
    %27 = arith.index_cast %26 : i32 to index
    %c1_13 = arith.constant 1 : index
    %c0_14 = arith.constant 0 : index
    %28 = vector.load %arg2[%c0_12, %27, %c1_13, %c0_14] : memref<1x20x18x4xf32, #tpu.memory_space<vmem>>, vector<1x6x16x4xf32>
    %29 = vector.shape_cast %28 : vector<1x6x16x4xf32> to vector<6x16x4xf32>
    %30 = arith.truncf %29 : vector<6x16x4xf32> to vector<6x16x4xbf16>
    %31 = vector.shape_cast %30 : vector<6x16x4xbf16> to vector<96x4xbf16>
    %c1_i32_15 = arith.constant 1 : i32
    %32 = arith.addi %1, %c1_i32_15 : i32
    %c0_16 = arith.constant 0 : index
    %33 = arith.index_cast %32 : i32 to index
    %c2_17 = arith.constant 2 : index
    %c0_18 = arith.constant 0 : index
    %34 = vector.load %arg2[%c0_16, %33, %c2_17, %c0_18] : memref<1x20x18x4xf32, #tpu.memory_space<vmem>>, vector<1x6x16x4xf32>
    %35 = vector.shape_cast %34 : vector<1x6x16x4xf32> to vector<6x16x4xf32>
    %36 = arith.truncf %35 : vector<6x16x4xf32> to vector<6x16x4xbf16>
    %37 = vector.shape_cast %36 : vector<6x16x4xbf16> to vector<96x4xbf16>
    %c2_i32 = arith.constant 2 : i32
    %38 = arith.addi %1, %c2_i32 : i32
    %c0_19 = arith.constant 0 : index
    %39 = arith.index_cast %38 : i32 to index
    %c0_20 = arith.constant 0 : index
    %c0_21 = arith.constant 0 : index
    %40 = vector.load %arg2[%c0_19, %39, %c0_20, %c0_21] : memref<1x20x18x4xf32, #tpu.memory_space<vmem>>, vector<1x6x16x4xf32>
    %41 = vector.shape_cast %40 : vector<1x6x16x4xf32> to vector<6x16x4xf32>
    %42 = arith.truncf %41 : vector<6x16x4xf32> to vector<6x16x4xbf16>
    %43 = vector.shape_cast %42 : vector<6x16x4xbf16> to vector<96x4xbf16>
    %c2_i32_22 = arith.constant 2 : i32
    %44 = arith.addi %1, %c2_i32_22 : i32
    %c0_23 = arith.constant 0 : index
    %45 = arith.index_cast %44 : i32 to index
    %c1_24 = arith.constant 1 : index
    %c0_25 = arith.constant 0 : index
    %46 = vector.load %arg2[%c0_23, %45, %c1_24, %c0_25] : memref<1x20x18x4xf32, #tpu.memory_space<vmem>>, vector<1x6x16x4xf32>
    %47 = vector.shape_cast %46 : vector<1x6x16x4xf32> to vector<6x16x4xf32>
    %48 = arith.truncf %47 : vector<6x16x4xf32> to vector<6x16x4xbf16>
    %49 = vector.shape_cast %48 : vector<6x16x4xbf16> to vector<96x4xbf16>
    %c2_i32_26 = arith.constant 2 : i32
    %50 = arith.addi %1, %c2_i32_26 : i32
    %c0_27 = arith.constant 0 : index
    %51 = arith.index_cast %50 : i32 to index
    %c2_28 = arith.constant 2 : index
    %c0_29 = arith.constant 0 : index
    %52 = vector.load %arg2[%c0_27, %51, %c2_28, %c0_29] : memref<1x20x18x4xf32, #tpu.memory_space<vmem>>, vector<1x6x16x4xf32>
    %53 = vector.shape_cast %52 : vector<1x6x16x4xf32> to vector<6x16x4xf32>
    %54 = arith.truncf %53 : vector<6x16x4xf32> to vector<6x16x4xbf16>
    %55 = vector.shape_cast %54 : vector<6x16x4xbf16> to vector<96x4xbf16>
    %56 = tpu.concatenate %7, %13, %19, %25, %31, %37, %43, %49, %55 in 1 : vector<96x4xbf16>, vector<96x4xbf16>, vector<96x4xbf16>, vector<96x4xbf16>, vector<96x4xbf16>, vector<96x4xbf16>, vector<96x4xbf16>, vector<96x4xbf16>, vector<96x4xbf16> -> vector<96x36xbf16>
    %c0_30 = arith.constant 0 : index
    %c0_31 = arith.constant 0 : index
    %c0_32 = arith.constant 0 : index
    %57 = vector.load %arg3[%c0_30, %c0_31, %c0_32] : memref<1x36x128xbf16, #tpu.memory_space<vmem>>, vector<1x36x128xbf16>
    %58 = vector.shape_cast %57 : vector<1x36x128xbf16> to vector<36x128xbf16>
    %cst = arith.constant dense<0.000000e+00> : vector<96x128xf32>
    %59 = tpu.matmul %56, %58, %cst {dimension_numbers = #tpu.dot_dimension_numbers<[1], [0], [0], [1], [0, 0, 1, 1], [], []>} : vector<96x36xbf16>, vector<36x128xbf16>, vector<96x128xf32> -> vector<96x128xf32>
    %60 = arith.truncf %59 : vector<96x128xf32> to vector<96x128xbf16>
    %c0_33 = arith.constant 0 : index
    %c0_34 = arith.constant 0 : index
    %c0_35 = arith.constant 0 : index
    %61 = vector.load %arg4[%c0_33, %c0_34, %c0_35] : memref<1x96x128xbf16, #tpu.memory_space<vmem>>, vector<1x96x128xbf16>
    %62 = vector.shape_cast %61 : vector<1x96x128xbf16> to vector<96x128xbf16>
    %63 = vector.shape_cast %60 : vector<96x128xbf16> to vector<1x96x128xbf16>
    tpu.vector_store %arg4[%c0_33, %c0_34, %c0_35], %63 {strides = array<i32>} : memref<1x96x128xbf16, #tpu.memory_space<vmem>>, vector<1x96x128xbf16>,
    return
  }
  func.func @transform_0(%arg0: i32, %arg1: i32) -> (i32, i32, i32, i32) {
    %c0_i32 = arith.constant 0 : i32
    %c0_i32_0 = arith.constant 0 : i32
    %c0_i32_1 = arith.constant 0 : i32
    %c0_i32_2 = arith.constant 0 : i32
    return %arg0, %c0_i32, %c0_i32_0, %c0_i32_1 : i32, i32, i32, i32
  }
  func.func @transform_1(%arg0: i32, %arg1: i32) -> (i32, i32, i32) {
    %c0_i32 = arith.constant 0 : i32
    %c0_i32_0 = arith.constant 0 : i32
    %c0_i32_1 = arith.constant 0 : i32
    return %arg0, %c0_i32, %c0_i32_0 : i32, i32, i32
  }
  func.func @transform_2(%arg0: i32, %arg1: i32) -> (i32, i32, i32) {
    %c0_i32 = arith.constant 0 : i32
    %c0_i32_0 = arith.constant 0 : i32
    return %arg0, %arg1, %c0_i32 : i32, i32, i32
  }
}

</mosaic_0001>

<bundles_post_ra>
// kernel: tpu_custom_call.1
= control target key start
LH: loop header
LB: loop body
LE: loop exit
PB: predicated region body
PF: predicated region fallthrough
CT: control target
= control target key end

     0   :  { %7 = vsyncpa [#allocation3], 0  ;;  %s1633_s0 = inlined_call_operand.vmem [shape: f32[2,20,18,4], index: 0, kind: input, shape index: {}]   ;;  %s1634_s1 = inlined_call_operand.vmem [shape: bf16[2,36,128], index: 1, kind: input, shape index: {}]   ;;  %s1635_s2 = inlined_call_operand.hbm [shape: bf16[2,288,128], index: 2, kind: output, shape index: {}]  }
   0x1   :  { %9 = vsyncpa [#allocation3 + $0x1], 0  ;;  %s1291_s9 = smov 0   ;;  %s1293_s10 = smov 0  }
   0x2   :  { %s1295_s11 = smov 0   ;;  %s1297_s12 = smov 0  }
   0x3   :  { %s1299_s13 = smov 0   ;;  %s1301_s14 = smov 0  }
   0x4   :  { %s1303_s15 = smov 0   ;;  %s1305_s16 = smov 0  }
   0x5 LB: > { %s895_s17 = sadd.s32 4294967295, %s1264_s16   ;;  %s896_s18 = sadd.s32 4294967294, %s1264_s16   ;;  %s1264_s16 = sphi %s1305_s16, %s15_s16   ;;  %s1260_s15 = sphi %s1303_s15, %s1644_s15   ;;  %s1256_s14 = sphi %s1301_s14, %s1643_s14   ;;  %s1252_s13 = sphi %s1299_s13, %s1642_s13   ;;  %s1248_s12 = sphi %s1297_s12, %s1641_s12   ;;  %s1244_s11 = sphi %s1295_s11, %s1640_s11   ;;  %s1240_s10 = sphi %s1293_s10, %s1639_s10   ;;  %s1236_s9 = sphi %s1291_s9, %s1638_s9  }
   0x6   : > { %s24_s19 = sadd.s32 1, %s1256_s14  ;;  %s27_s20 = sadd.s32 1, %s1260_s15 }
   0x7   : > { %p25_p0 = scmp.ge.s32.totalorder %s24_s19, 3  ;;  %p98_p1 = scmp.ne.s32.totalorder %s1244_s11, %s1240_s10 }
   0x8   : > { %p99_p2 = scmp.eq.s32.totalorder %s895_s17, 5  ;;  %p104_p5 = scmp.ne.s32.totalorder %s1240_s10, %s1236_s9 }
   0x9   : > { %s1646_s19 = smov (%p25_p0, %s24_s19), 0  ;;  %s1648_s20 = smov (!%p25_p0, %s27_s20), %s1260_s15 }
   0xa   : > { %s84_s21 = ssub.s32 %s1256_s14, %s1646_s19  ;;  %p1342_p3 = por %p99_p2, %p98_p1 }
   0xb   : > { %p29_p4 = scmp.ge.s32.totalorder %s1648_s20, 2  ;;  %p105_p6 = scmp.eq.s32.totalorder %s896_s18, 5 }
   0xc   : > { %p899_p7 = scmp.ge.s32.totalorder %s1264_s16, 1  ;;  %p139_p9 = scmp.lt.s32.totalorder %s1264_s16, 7 }
   0xd   : > { %s1650_s20 = smov (%p29_p4, %s1648_s20), 0  ;;  %p1351_p8 = por %p105_p6, %p104_p5 }
   0xe   : > { %s83_s24 = ssub.s32 %s1260_s15, %s1650_s20  ;;  %s88_s25 = sadd.s32 1, %s1244_s11 }
   0xf   : > { %s85_s26 = sor.u32 %s84_s21, %s83_s24  ;;  %p140_p10 = pnand %p899_p7, %p139_p9 }
  0x10   : > { %p86_p11 = scmp.eq.s32.totalorder %s85_s26, 0  ;;  %p166_p12 = scmp.lt.s32.totalorder (!%p140_p10), %s1252_s13, 1  ;;  %vm636_vm0 = vcmask (!%p140_p10), 1041408   ;;  %vm493_vm1 = vcmask (!%p140_p10), 31744   ;;  %vm512_vm2 = vcmask (!%p140_p10), 64512   ;;  %vm525_vm3 = vcmask (!%p140_p10), 97280  }
  0x11   : > { %143 = sbr.rel (%p140_p10) target bundleno = 474 (0x1da), region = 28  ;;  %s1266_s7 = smov (!%p140_p10), 8   ;;  %vm538_vm4 = vcmask (!%p140_p10), 130048   ;;  %vm551_vm5 = vcmask (!%p140_p10), 162816   ;;  %vm564_vm6 = vcmask (!%p140_p10), 195584   ;;  %vm577_vm7 = vcmask (!%p140_p10), 228352  }
  0x12   : > { %s1360_s27 = scalar_select %p86_p11, %s1244_s11, %s88_s25  }
  0x13   : > { %s902_s29 = smul.u32 (!%p140_p10), 144, %s1248_s12  ;;  %s1267_s8 = smov (!%p140_p10), 4   ;;  %vm590_vm8 = vcmask (!%p140_p10), 261120   ;;  %vm623_vm9 = vcmask (!%p140_p10), 293888  }
  0x14   : > { %s1268_s18 = smov (!%p140_p10), 12   ;;  %s1269_s26 = smov (!%p140_p10), 16  }
  0x15   : > { %s1273_s3 = smov (!%p140_p10), 32   ;;  %s163_s4 = sand.u32 (!%p140_p10), 1, %s1240_s10  }
  0x18   : > { %s1364_s28 = scalar_select %p166_p12, %s1252_s13, 1 }
  0x1a   : > { %s1084_s30 = smul.u32 480, %s1364_s28 }
  0x1b   : > { %s1085_s17 = smul.u32 20, %s1364_s28  ;;  %s1270_s28 = smov 20  }
  0x1c   : > { %s170_s5 = scalar_lea.vmem %s1633_s0, %s1084_s30  ;;  %s1272_s30 = smov 28  }
  0x1d   : > { %s1371_s6 = scalar_lea.vmem %s170_s5, %s902_s29  ;;  %s175_s25 = scalar_lea.vmem %s1634_s1, %s1085_s17 }
  0x1e   : > { %v221_v0 = vld [vmem:[%s1371_s6 + $0x32] sm:$0xff]  ;;  %v222_v1 = vld [vmem:[%s1371_s6 + $0x3a] sm:$0xff]  ;;  %v223_v5 = vld [vmem:[%s1371_s6 + $0x4a] sm:$0xff]  ;;  %s1271_s29 = smov 24   ;;  %s1083_s5 = smul.u32 48, %s163_s4 }
  0x1f   : > { %v203_v2 = vld [vmem:[%s1371_s6 + $0x31] sm:$0xff]  ;;  %v1376_v3 = vpack.c.bf16 %v222_v1, %v221_v0  ;;  %v204_v4 = vld [vmem:[%s1371_s6 + $0x39] sm:$0xff]  ;;  %v205_v8 = vld [vmem:[%s1371_s6 + $0x49] sm:$0xff]  ;;  %s1086_s17 = smul.u32 36, %s1252_s13 }
  0x20   : > { %v224_v6 = vld [vmem:[%s1371_s6 + $0x52] sm:$0xff]  ;;  %v1381_v7 = vpack.c.bf16 %v204_v4, %v203_v2  ;;  %v910_v12 = vld [vmem:[%s1371_s6 + $0x60] sm:$0xff]  ;;  %v911_v13 = vld [vmem:[%s1371_s6 + $0x68] sm:$0xff] }
  0x21   : > { %v206_v9 = vld [vmem:[%s1371_s6 + $0x51] sm:$0xff]  ;;  %377 = vrot.lane.b32.xlu1 %v1376_v3, %s1266_s7  ;;  %v1387_v10 = vpack.c.bf16 %v224_v6, %v223_v5  ;;  %v908_v14 = vld [vmem:[%s1371_s6 + $0x48] sm:$0xff]  ;;  %v1399_v16 = vpack.c.bf16 %v911_v13, %v910_v12  ;;  %v948_v25 = vld [vmem:[%s1371_s6 + $0x80] sm:$0xff] }
  0x22   : > { %359 = vrot.lane.b32.xlu0 %v1381_v7, %s1267_s8  ;;  %v1391_v11 = vpack.c.bf16 %v206_v9, %v205_v8  ;;  %v909_v15 = vld [vmem:[%s1371_s6 + $0x50] sm:$0xff]  ;;  %v922_v18 = vld [vmem:[%s1371_s6 + $0x61] sm:$0xff]  ;;  %v947_v23 = vld [vmem:[%s1371_s6 + $0x78] sm:$0xff] }
  0x23   : > { %v1403_v17 = vpack.c.bf16 %v909_v15, %v908_v14  ;;  %v923_v19 = vld [vmem:[%s1371_s6 + $0x69] sm:$0xff]  ;;  %v1167_v26 = vld [vmem:[%s175_s25] sm:$0xff]   ;;  %v1423_v28 = vpack.c.bf16 %v948_v25, %v947_v23  ;;  %v904_v49 = vld [vmem:[%s1371_s6 + $0x18] sm:$0xff] }
  0x24   : > { %v271_v20 = vpack.c.bf16 %v923_v19, %v922_v18  ;;  %v934_v21 = vld [vmem:[%s1371_s6 + $0x62] sm:$0xff]  ;;  %v935_v22 = vld [vmem:[%s1371_s6 + $0x6a] sm:$0xff]  ;;  %1075 = vmatprep.subr.bf16.mxu1 %v1167_v26  ;;  %1057 = vmatprep.subr.bf16.mxu0 %v1167_v26  ;;  %v959_v29 = vld [vmem:[%s1371_s6 + $0x79] sm:$0xff] }
  0x25   : > { %379 = vrot.lane.b32.xlu1 %v1387_v10, %s1266_s7  ;;  %v289_v24 = vpack.c.bf16 %v935_v22, %v934_v21  ;;  %v1168_v27 = vld [vmem:[%s175_s25 + $0x8] sm:$0xff]   ;;  %1078 = vmatpush3.bf16.msra.mxu1 %v1167_v26  ;;  %v1169_v31 = vld [vmem:[%s175_s25 + $0x10] ss:$0 sps:$4 sm:$0x33]   ;;  %v971_v37 = vld [vmem:[%s1371_s6 + $0x7a] sm:$0xff] }
  0x26   : > { %361 = vrot.lane.b32.xlu0 %v1391_v11, %s1267_s8  ;;  %v960_v30 = vld [vmem:[%s1371_s6 + $0x81] sm:$0xff]  ;;  %1076 = vmatprep.subr.bf16.mxu1 %v1168_v27  ;;  %v200_v34 = vld [vmem:[%s1371_s6 + $0x9] sm:$0xff]  ;;  %v638_v35 = vsel %vm636_vm0, %v1169_v31, 0  ;;  %v201_v40 = vld [vmem:[%s1371_s6 + $0x19] sm:$0xff] }
  0x27   : > { %1058 = vmatpush3.bf16.msra.mxu0 %v1167_v26  ;;  %v328_v32 = vpack.c.bf16 %v960_v30, %v959_v29  ;;  %v199_v33 = vld [vmem:[%s1371_s6 + $0x1] sm:$0xff]  ;;  %v218_v44 = vld [vmem:[%s1371_s6 + $0xa] sm:$0xff]  ;;  %v915_v53 = vld [vmem:[%s1371_s6 + $0x98] sm:$0xff] }
  0x28   : > { %1059 = vmatprep.subr.bf16.mxu0 %v1168_v27  ;;  %v211_v36 = vpack.c.bf16 %v200_v34, %v199_v33  ;;  %v972_v38 = vld [vmem:[%s1371_s6 + $0x82] sm:$0xff]  ;;  %v219_v46 = vld [vmem:[%s1371_s6 + $0x1a] sm:$0xff]  ;;  %v914_v52 = vld [vmem:[%s1371_s6 + $0x90] sm:$0xff] }
  0x29   : > { %397 = vrot.lane.b32.xlu1 %v1399_v16, %s1268_s18  ;;  %1079 = vmatpush3.bf16.msra.mxu1 %v1168_v27  ;;  %v346_v39 = vpack.c.bf16 %v972_v38, %v971_v37  ;;  %v202_v41 = vld [vmem:[%s1371_s6 + $0x21] sm:$0xff]  ;;  %v906_v54 = vld [vmem:[%s1371_s6 + $0x30] sm:$0xff]  ;;  %v907_v55 = vld [vmem:[%s1371_s6 + $0x38] sm:$0xff]  ;;  %v255_v56 = vpack.c.bf16 %v915_v53, %v914_v52 }
  0x2a   : > { %395 = vrot.lane.b32.xlu0 %v1403_v17, %s1268_s18  ;;  %1082 = vmatprep.subr.msk.bf16.mxu1 %vm636_vm0, %v1169_v31  ;;  %v212_v42 = vpack.c.bf16 %v202_v41, %v201_v40  ;;  %v217_v43 = vld [vmem:[%s1371_s6 + $0x2] sm:$0xff]  ;;  %v251_v57 = vpack.c.bf16 %v907_v55, %v906_v54  ;;  %v926_v58 = vld [vmem:[%s1371_s6 + $0x91] sm:$0xff]  ;;  %v927_v59 = vld [vmem:[%s1371_s6 + $0x99] sm:$0xff] }
  0x2b   : > { %1060 = vmatpush3.bf16.msra.mxu0 %v1168_v27  ;;  %v229_v45 = vpack.c.bf16 %v218_v44, %v217_v43  ;;  %v220_v47 = vld [vmem:[%s1371_s6 + $0x22] sm:$0xff]  ;;  %v273_v60 = vpack.c.bf16 %v927_v59, %v926_v58  ;;  %v938_v61 = vld [vmem:[%s1371_s6 + $0x92] sm:$0xff]  ;;  %v939_v62 = vld [vmem:[%s1371_s6 + $0x9a] sm:$0xff] }
  0x2c   : > { %1081 = vmatprep.subr.msk.bf16.mxu0 %vm636_vm0, %v1169_v31  ;;  %v230_v48 = vpack.c.bf16 %v220_v47, %v219_v46  ;;  %v905_v50 = vld [vmem:[%s1371_s6 + $0x20] sm:$0xff]  ;;  %v291_v63 = vpack.c.bf16 %v939_v62, %v938_v61  ;;  %v951_v0 = vld [vmem:[%s1371_s6 + $0xa8] sm:$0xff]  ;;  %v952_v1 = vld [vmem:[%s1371_s6 + $0xb0] sm:$0xff] }
  0x2d   : > { %415 = vrot.lane.b32.xlu1 %v271_v20, %s1269_s26  ;;  %1080 = vmatpush3.bf16.msra.mxu1 %v638_v35  ;;  %v1457_v51 = vpack.c.bf16 %v905_v50, %v904_v49  ;;  %v312_v2 = vpack.c.bf16 %v952_v1, %v951_v0  ;;  %v963_v4 = vld [vmem:[%s1371_s6 + $0xa9] sm:$0xff]  ;;  %v964_v5 = vld [vmem:[%s1371_s6 + $0xb1] sm:$0xff] }
  0x2e   : > { %413 = vrot.lane.b32.xlu0 %v1391_v11, %s1269_s26  ;;  %v330_v6 = vpack.c.bf16 %v964_v5, %v963_v4  ;;  %v975_v8 = vld [vmem:[%s1371_s6 + $0xaa] sm:$0xff]  ;;  %v976_v9 = vld [vmem:[%s1371_s6 + $0xb2] sm:$0xff] }
  0x2f   : > { %1062 = vmatpush3.bf16.msra.mxu0 %v638_v35  ;;  %v348_v12 = vpack.c.bf16 %v976_v9, %v975_v8  ;;  %v181_v8 = vld [vmem:[%s1371_s6] sm:$0xff]  ;;  %v182_v9 = vld [vmem:[%s1371_s6 + $0x8] sm:$0xff]  ;;  %s165_s6 = scalar_lea.vmem [#allocation2], %s1083_s5 }
  0x30   : > { %s797_s21 = sshll.u32 %s165_s6, 4  ;;  %s1571_s21 = int_to_ptr.vmem [resolvable:$true] %s797_s21 }
  0x31   : > { %433 = vrot.lane.b32.xlu1 %v289_v24, %s1270_s28 }
  0x32   : > { %431 = vrot.lane.b32.xlu0 %v1387_v10, %s1270_s28 }
  0x35   : > { %451 = vrot.lane.b32.xlu1 %v1423_v28, %s1271_s29 }
  0x36   : > { %449 = vrot.lane.b32.xlu0 %v1399_v16, %s1271_s29 }
  0x39   : > { %469 = vrot.lane.b32.xlu1 %v328_v32, %s1272_s30 }
  0x3a   : > { %467 = vrot.lane.b32.xlu0 %v271_v20, %s1272_s30 }
  0x3d   : > { %355 = vrot.lane.b32.xlu1 %v211_v36, %s1267_s8 }
  0x3e   : > { %485 = vrot.lane.b32.xlu0 %v289_v24, %s1273_s3 }
  0x41   : > { %487 = vrot.lane.b32.xlu1 %v346_v39, %s1273_s3 }
  0x42   : > { %363 = vrot.lane.b32.xlu0 %v271_v20, %s1267_s8 }
  0x45   : > { %365 = vrot.lane.b32.xlu1 %v328_v32, %s1267_s8 }
  0x46   : > { %357 = vrot.lane.b32.xlu0 %v212_v42, %s1267_s8 }
  0x49   : > { %381 = vrot.lane.b32.xlu1 %v289_v24, %s1266_s7 }
  0x4a   : > { %373 = vrot.lane.b32.xlu0 %v229_v45, %s1266_s7 }
  0x4d   : > { %383 = vrot.lane.b32.xlu1 %v346_v39, %s1266_s7 }
  0x4e   : > { %375 = vrot.lane.b32.xlu0 %v230_v48, %s1266_s7  ;;  %s789_s7 = smul.u32 12, %s1248_s12 }
  0x51   : > { %399 = vrot.lane.b32.xlu1 %v1423_v28, %s1268_s18 }
  0x52   : > { %391 = vrot.lane.b32.xlu0 %v1457_v51, %s1268_s18 }
  0x55   : > { %401 = vrot.lane.b32.xlu1 %v255_v56, %s1268_s18 }
  0x56   : > { %393 = vrot.lane.b32.xlu0 %v251_v57, %s1268_s18  ;;  %s794_s18 = sadd.s32 %s1086_s17, %s789_s7 }
  0x57   : > { %s998_s24 = sshll.u32 %s794_s18, 6 }
  0x58   : > { %s1576_s25 = scalar_lea.hbm %s1635_s2, %s998_s24 }
  0x59   : > { %417 = vrot.lane.b32.xlu1 %v328_v32, %s1269_s26 }
  0x5a   : > { %409 = vrot.lane.b32.xlu0 %v212_v42, %s1269_s26 }
  0x5d   : > { %419 = vrot.lane.b32.xlu1 %v273_v60, %s1269_s26 }
  0x5e   : > { %411 = vrot.lane.b32.xlu0 %v1381_v7, %s1269_s26  ;;  %s1580_s26 = scalar_lea.sflag [#allocation3], %s163_s4 }
  0x61   : > { %435 = vrot.lane.b32.xlu1 %v346_v39, %s1270_s28 }
  0x62   : > { %427 = vrot.lane.b32.xlu0 %v230_v48, %s1270_s28 }
  0x65   : > { %437 = vrot.lane.b32.xlu1 %v291_v63, %s1270_s28 }
  0x66   : > { %429 = vrot.lane.b32.xlu0 %v1376_v3, %s1270_s28  ;;  %s1170_s28 = scalar_lea.vmem %s1571_s21, 768 }
  0x67   : > { %p1171_p13 = scmp.ne.s32.totalorder %s1571_s21, %s1170_s28 }
  0x69   : > { %453 = vrot.lane.b32.xlu1 %v255_v56, %s1271_s29  ;;  %p1172_p0 = pnand %p1171_p13, %p1342_p3 }
  0x6a   : > { %445 = vrot.lane.b32.xlu0 %v251_v57, %s1271_s29 }
  0x6b   : > { %p1173_p1 = pneg %p1172_p0 }
  0x6d   : > { %455 = vrot.lane.b32.xlu1 %v312_v2, %s1271_s29 }
  0x6e   : > { %447 = vrot.lane.b32.xlu0 %v1403_v17, %s1271_s29  ;;  %s1274_s29 = smov [#allocation2]  }
  0x71   : > { %471 = vrot.lane.b32.xlu1 %v273_v60, %s1272_s30 }
  0x72   : > { %463 = vrot.lane.b32.xlu0 %v1381_v7, %s1272_s30 }
  0x75   : > { %473 = vrot.lane.b32.xlu1 %v330_v6, %s1272_s30 }
  0x76   : > { %465 = vrot.lane.b32.xlu0 %v1391_v11, %s1272_s30  ;;  %s1174_s30 = sshll.u32 %s1274_s29, 4  ;;  %s1175_s30 = int_to_ptr.vmem [resolvable:$false] %s1174_s30 }
  0x77   : > { %p1177_p2 = scmp.lt.s32.totalorder %s1571_s21, %s1175_s30 }
  0x79   : > { %489 = vrot.lane.b32.xlu1 %v291_v63, %s1273_s3 }
  0x7a   : > { %481 = vrot.lane.b32.xlu0 %v1376_v3, %s1273_s3 }
  0x7d   : > { %491 = vrot.lane.b32.xlu1 %v348_v12, %s1273_s3 }
  0x7e   : > { %483 = vrot.lane.b32.xlu0 %v1387_v10, %s1273_s3  ;;  %s1176_s3 = scalar_lea.vmem %s1175_s30, 1536 }
  0x7f   : > { %p1178_p4 = scmp.lt.s32.totalorder %s1176_s3, %s1170_s28 }
  0x81   : > { %p1179_p5 = por %p1178_p4, %p1177_p2 }
  0x83   : > { %p1180_p6 = pnand %p1179_p5, %p1173_p1 }
  0x93   : > { %v378_v13 = vpop.permute.xlu1 %377 }
  0x94   : > { %v360_v7 = vpop.permute.xlu0 %359 }
  0x95   : > { %v502_v24 = vsel %vm493_vm1, %v251_v57, %v360_v7 }
  0x96   : > { %v518_v25 = vsel %vm512_vm2, %v502_v24, %v378_v13 }
  0x97   : > { %v380_v14 = vpop.permute.xlu1 %379 }
  0x98   : > { %v362_v15 = vpop.permute.xlu0 %361 }
  0x99   : > { %v505_v10 = vsel %vm493_vm1, %v1403_v17, %v362_v15 }
  0x9a   : > { %v520_v31 = vsel %vm512_vm2, %v505_v10, %v380_v14  ;;  %v193_v14 = vpack.c.bf16 %v182_v9, %v181_v8 }
  0x9b   : > { %v398_v18 = vpop.permute.xlu1 %397 }
  0x9c   : > { %v396_v19 = vpop.permute.xlu0 %395  ;;  %v533_v33 = vsel %vm525_vm3, %v520_v31, %v398_v18 }
  0x9d   : > { %v531_v27 = vsel %vm525_vm3, %v518_v25, %v396_v19 }
  0x9f   : > { %v416_v11 = vpop.permute.xlu1 %415 }
  0xa0   : > { %v414_v20 = vpop.permute.xlu0 %413  ;;  %v546_v35 = vsel %vm538_vm4, %v533_v33, %v416_v11 }
  0xa1   : > { %v544_v30 = vsel %vm538_vm4, %v531_v27, %v414_v20 }
  0xa3   : > { %v434_v21 = vpop.permute.xlu1 %433 }
  0xa4   : > { %v432_v22 = vpop.permute.xlu0 %431  ;;  %v559_v38 = vsel %vm551_vm5, %v546_v35, %v434_v21 }
  0xa5   : > { %v557_v32 = vsel %vm551_vm5, %v544_v30, %v432_v22 }
  0xa7   : > { %v452_v23 = vpop.permute.xlu1 %451 }
  0xa8   : > { %v450_v3 = vpop.permute.xlu0 %449  ;;  %v572_v40 = vsel %vm564_vm6, %v559_v38, %v452_v23 }
  0xa9   : > { %v570_v17 = vsel %vm564_vm6, %v557_v32, %v450_v3 }
  0xab   : > { %v470_v26 = vpop.permute.xlu1 %469 }
  0xac   : > { %v468_v29 = vpop.permute.xlu0 %467  ;;  %v585_v41 = vsel %vm577_vm7, %v572_v40, %v470_v26 }
  0xad   : > { %v583_v36 = vsel %vm577_vm7, %v570_v17, %v468_v29 }
  0xaf   : > { %v356_v34 = vpop.permute.xlu1 %355 }
  0xb0   : > { %v486_v37 = vpop.permute.xlu0 %485  ;;  %v496_v11 = vsel %vm493_vm1, %v193_v14, %v356_v34 }
  0xb1   : > { %v596_v39 = vsel %vm590_vm8, %v583_v36, %v486_v37 }
  0xb2   : > { %1067 = vmatprep.mubr.msk.bf16.mxu1 %vm623_vm9, %v596_v39 }
  0xb3   : > { %v488_v42 = vpop.permute.xlu1 %487 }
  0xb4   : > { %v364_v43 = vpop.permute.xlu0 %363  ;;  %v598_v44 = vsel %vm590_vm8, %v585_v41, %v488_v42 }
  0xb5   : > { %1068 = vmatmul.mubr.msk.bf16.vlgmr.msra.gmra.mrb[0].mxu1 %vm623_vm9, %v598_v44  ;;  %v508_v19 = vsel %vm493_vm1, %v1399_v16, %v364_v43 }
  0xb7   : > { %v366_v45 = vpop.permute.xlu1 %365 }
  0xb8   : > { %v358_v46 = vpop.permute.xlu0 %357  ;;  %v511_v25 = vsel %vm493_vm1, %v1423_v28, %v366_v45 }
  0xb9   : > { %v499_v50 = vsel %vm493_vm1, %v1457_v51, %v358_v46 }
  0xbb   : > { %v382_v47 = vpop.permute.xlu1 %381 }
  0xbc   : > { %v374_v48 = vpop.permute.xlu0 %373  ;;  %v522_v20 = vsel %vm512_vm2, %v508_v19, %v382_v47 }
  0xbd   : > { %v514_v21 = vsel %vm512_vm2, %v496_v11, %v374_v48 }
  0xbf   : > { %v384_v49 = vpop.permute.xlu1 %383 }
  0xc0   : > { %v376_v52 = vpop.permute.xlu0 %375  ;;  %v524_v29 = vsel %vm512_vm2, %v511_v25, %v384_v49 }
  0xc1   : > { %v516_v53 = vsel %vm512_vm2, %v499_v50, %v376_v52 }
  0xc3   : > { %v400_v54 = vpop.permute.xlu1 %399 }
  0xc4   : > { %v392_v55 = vpop.permute.xlu0 %391  ;;  %v535_v22 = vsel %vm525_vm3, %v522_v20, %v400_v54 }
  0xc5   : > { %v527_v24 = vsel %vm525_vm3, %v514_v21, %v392_v55 }
  0xc7   : > { %v402_v56 = vpop.permute.xlu1 %401 }
  0xc8   : > { %v394_v57 = vpop.permute.xlu0 %393  ;;  %v537_v32 = vsel %vm525_vm3, %v524_v29, %v402_v56 }
  0xc9   : > { %v529_v58 = vsel %vm525_vm3, %v516_v53, %v394_v57 }
  0xcb   : > { %v418_v59 = vpop.permute.xlu1 %417 }
  0xcc   : > { %v410_v60 = vpop.permute.xlu0 %409  ;;  %v548_v3 = vsel %vm538_vm4, %v535_v22, %v418_v59 }
  0xcd   : > { %v540_v26 = vsel %vm538_vm4, %v527_v24, %v410_v60 }
  0xcf   : > { %v420_v61 = vpop.permute.xlu1 %419 }
  0xd0   : > { %v412_v62 = vpop.permute.xlu0 %411  ;;  %v550_v28 = vsel %vm538_vm4, %v537_v32, %v420_v61 }
  0xd1   : > { %v542_v63 = vsel %vm538_vm4, %v529_v58, %v412_v62 }
  0xd3   : > { %v436_v0 = vpop.permute.xlu1 %435 }
  0xd4   : > { %v428_v1 = vpop.permute.xlu0 %427  ;;  %v561_v16 = vsel %vm551_vm5, %v548_v3, %v436_v0 }
  0xd5   : > { %v553_v30 = vsel %vm551_vm5, %v540_v26, %v428_v1 }
  0xd7   : > { %v438_v51 = vpop.permute.xlu1 %437 }
  0xd8   : > { %v430_v2 = vpop.permute.xlu0 %429  ;;  %v563_v38 = vsel %vm551_vm5, %v550_v28, %v438_v51 }
  0xd9   : > { %v555_v4 = vsel %vm551_vm5, %v542_v63, %v430_v2 }
  0xdb   : > { %v454_v5 = vpop.permute.xlu1 %453 }
  0xdc   : > { %v446_v6 = vpop.permute.xlu0 %445  ;;  %v574_v31 = vsel %vm564_vm6, %v561_v16, %v454_v5 }
  0xdd   : > { %v566_v33 = vsel %vm564_vm6, %v553_v30, %v446_v6 }
  0xdf   : > { %v456_v12 = vpop.permute.xlu1 %455 }
  0xe0   : > { %v448_v13 = vpop.permute.xlu0 %447  ;;  %v576_v40 = vsel %vm564_vm6, %v563_v38, %v456_v12 }
  0xe1   : > { %v568_v7 = vsel %vm564_vm6, %v555_v4, %v448_v13 }
  0xe3   : > { %v472_v15 = vpop.permute.xlu1 %471 }
  0xe4   : > { %v464_v18 = vpop.permute.xlu0 %463  ;;  %v587_v17 = vsel %vm577_vm7, %v574_v31, %v472_v15 }
  0xe5   : > { %v579_v35 = vsel %vm577_vm7, %v566_v33, %v464_v18 }
  0xe7   : > { %v474_v23 = vpop.permute.xlu1 %473 }
  0xe8   : > { %v466_v10 = vpop.permute.xlu0 %465  ;;  %v589_v41 = vsel %vm577_vm7, %v576_v40, %v474_v23 }
  0xe9   : > { %v581_v27 = vsel %vm577_vm7, %v568_v7, %v466_v10 }
  0xeb   : > { %v490_v34 = vpop.permute.xlu1 %489 }
  0xec   : > { %v482_v36 = vpop.permute.xlu0 %481  ;;  %v600_v37 = vsel %vm590_vm8, %v587_v17, %v490_v34 }
  0xed   : > { %v592_v39 = vsel %vm590_vm8, %v579_v35, %v482_v36  ;;  %1071 = vmatprep.mubr.msk.bf16.mxu1 %vm623_vm9, %v600_v37 }
  0xee   : > { %1063 = vmatprep.mubr.msk.bf16.mxu0 %vm623_vm9, %v592_v39 }
  0xef   : > { %v492_v42 = vpop.permute.xlu1 %491 }
  0xf0   : > { %v484_v43 = vpop.permute.xlu0 %483  ;;  %v602_v44 = vsel %vm590_vm8, %v589_v41, %v492_v42 }
  0xf1   : > { %v594_v45 = vsel %vm590_vm8, %v581_v27, %v484_v43  ;;  %1072 = vmatmul.mubr.msk.bf16.gmra.mrb[4].mxu1 %vm623_vm9, %v602_v44 }
  0xf2   : > { %1064 = vmatmul.mubr.msk.bf16.vlgmr.msra.gmra.mrb[0].mxu0 %vm623_vm9, %v594_v45 }
 0x188   : > { %v1069_v46 = vpop.f32.mrb[0].mxu1 }
 0x189   : > { %v690_v47 = vpop.f32.mrb[1].mxu1 }
 0x18a   : > { %v1070_v48 = vpop.f32.mrb[2].mxu1 }
 0x18b   : > { %v1031_v49 = vpack.c.bf16 %v1070_v48, %v1069_v46  ;;  %v693_v50 = vpop.f32.mrb[3].mxu1 }
 0x18c   : > { %v1026_v52 = vpack.c.bf16 %v693_v50, %v690_v47 }
 0x18d   : > { %1045 = vst [vmem:[%s165_s6 + $0x18] sm:$0xff] %v1031_v49  }
 0x18e   : > { %1044 = vst [vmem:[%s165_s6 + $0x10] sm:$0xff] %v1026_v52  }
 0x1c4   : > { %v1073_v53 = vpop.f32.mrb[4].mxu1 }
 0x1c5   : > { %v1065_v54 = vpop.f32.mrb[0].mxu0  ;;  %v706_v55 = vpop.f32.mrb[5].mxu1 }
 0x1c6   : > { %v674_v56 = vpop.f32.mrb[1].mxu0  ;;  %v1074_v57 = vpop.f32.mrb[6].mxu1 }
 0x1c7   : > { %v1066_v58 = vpop.f32.mrb[2].mxu0  ;;  %v1041_v59 = vpack.c.bf16 %v1074_v57, %v1073_v53  ;;  %v709_v60 = vpop.f32.mrb[7].mxu1 }
 0x1c8   : > { %v1021_v61 = vpack.c.bf16 %v1066_v58, %v1065_v54  ;;  %v677_v62 = vpop.f32.mrb[3].mxu0  ;;  %v1036_v63 = vpack.c.bf16 %v709_v60, %v706_v55 }
 0x1c9   : > { %1047 = vst [vmem:[%s165_s6 + $0x28] sm:$0xff] %v1041_v59   ;;  %v1016_v0 = vpack.c.bf16 %v677_v62, %v674_v56 }
 0x1ca   : > { %1043 = vst [vmem:[%s165_s6 + $0x8] sm:$0xff] %v1021_v61   ;;  %1046 = vst [vmem:[%s165_s6 + $0x20] sm:$0xff] %v1036_v63  }
 0x1cb   : > { %1017 = vst [vmem:[%s165_s6] sm:$0xff] %v1016_v0  }
 0x1cc   : > { %1183 = shalt.err (!%p1180_p6)
}
 0x1cd   : > { %s1184_s4 = scalar_lea.hbm %s1576_s25, 768  ;;  %s1188_s7 = scalar_lea.hbm %s1635_s2, 4608 }
 0x1ce   : > { %p1185_p7 = scmp.ne.s32.totalorder %s1576_s25, %s1184_s4  ;;  %p1189_p11 = scmp.lt.u32.totalorder %s1576_s25, %s1635_s2 }
 0x1cf   : > { %p1190_p12 = scmp.lt.u32.totalorder %s1188_s7, %s1184_s4  ;;  %p1192_p0 = scmp.lt.u32.totalorder %s1184_s4, %s1576_s25 }
 0x1d0   : > { %p1186_p9 = pnand %p1185_p7, %p1342_p3 }
 0x1d1   : > { %p1191_p13 = por %p1190_p12, %p1189_p11 }
 0x1d2   : > { %p1187_p10 = pneg %p1186_p9 }
 0x1d3   : > { %p1193_p1 = por %p1192_p0, %p1191_p13 }
 0x1d5   : > { %p1194_p2 = pnand %p1193_p1, %p1187_p10 }
 0x1d7   : > { %1197 = shalt.err (!%p1194_p2)
}
 0x1d8   : > { %s1275_s24 = smov 64  }
 0x1d9   : > { %1087 = dma.vmem_to_hbm [thread:$0]  (%p1342_p3), %s1571_s21, 768, %s1576_s25, %s1580_s26, %s1275_s24, %s1275_s24, %s1267_s8  }
 0x1da PF: > { %p1093_p4 = scmp.ge.s32.totalorder %s1264_s16, 2  ;;  %s812_s12 = sand.u32 1, %s1236_s9  }
 0x1db   : > { %s813_s13 = scalar_lea.sflag [#allocation3], %s812_s12 }
 0x1dc   : > { %p1090_p5 = pnand %p1093_p4, %p1351_p8 }
 0x1de   : > { %1231 = dma.done.wait (!%p1090_p5), %s813_s13, 768  }
 0x1df   : > { %1233 = vsyncadd (!%p1090_p5), %s813_s13, 4294966528  ;;  %s15_s16 = sadd.s32 1, %s1264_s16   ;;  %s1638_s9 = smov %s1240_s10 }
 0x1e0   : > { %p12_p6 = scmp.ge.s32.totalorder %s15_s16, 8   ;;  %s1639_s10 = smov %s1244_s11 }
 0x1e1   : > { %s1640_s11 = smov %s1360_s27  ;;  %s1641_s12 = smov %s1256_s14 }
 0x1e2   : > { %s1642_s13 = smov %s1260_s15  ;;  %s1643_s14 = smov %s1646_s19 }
 0x1e3   : > { %s1644_s15 = smov %s1650_s20  ;;  %14 = sbr.rel (!%p12_p6) target bundleno = 5 (0x5), region = 69 }
 0x1ea   :  { %818 = vsyncpa [#allocation3], 1 }
 0x1eb   :  { %820 = vsyncpa [#allocation3 + $0x1], 1 }

</bundles_post_ra>
